<compile_context>
chip_gen: v5e
topology: v5e:2x2
jax: 0.10.0
libtpu: 0.0.40
codegen_flags: <defaults>
</compile_context>

<pallas_src>
import functools

import jax
import jax.numpy as jnp
from jax.experimental import pallas as pl
from jax.experimental.pallas import tpu as pltpu

LANE = 128

# Small compatibility hedges (newer API names preferred, older fallbacks).
_SQUEEZED = pl.Squeezed() if hasattr(pl, "Squeezed") else None
_SMEM_SPACE = (pltpu.MemorySpace.SMEM
               if hasattr(pltpu, "MemorySpace") else pltpu.SMEM)


def _round_up(v, m):
    return (v + m - 1) // m * m


def _vmem_limit(in_out_block_bytes, scratch_bytes=0):
    # Inputs/outputs are double-buffered by the Pallas pipeline; add headroom
    # and clamp to a budget that is safe on v5e (16 MiB scoped default) through
    # v7x (64 MiB physical VMEM).
    need = 2 * in_out_block_bytes + scratch_bytes + (4 << 20)
    return int(min(max(need, 16 << 20), 64 << 20))


# --------------------------------------------------------------------------- #
# Kernel 1: basis (+ self-loop) transform   H_b = x @ basis_b,  H_self = x @ W_s
# --------------------------------------------------------------------------- #
def _transform_kernel(x_ref, w_ref, hb_ref, hs_ref, *, num_bases):
    x = x_ref[...]                                    # (TN, d_in) bf16 tile
    for b in range(num_bases):                        # B MXU matmuls, f32 accum
        hb_ref[b] = jnp.dot(x, w_ref[b],
                            preferred_element_type=jnp.float32
                            ).astype(hb_ref.dtype)
    hs_ref[...] = jnp.dot(x, w_ref[num_bases],        # self-loop transform
                          preferred_element_type=jnp.float32
                          ).astype(hs_ref.dtype)


def transform_pallas(x, w_all, *, tile_n=128):
    """x: (N_p, d_in_p) bf16; w_all: (B+1, d_in_p, d_out_p) bf16 where the last
    slice is W_self.  Returns (H_bases (B, N_p, d_out_p), H_self (N_p, d_out_p))
    in bf16."""
    N_p, d_in_p = x.shape
    K, _, d_out_p = w_all.shape
    B = K - 1

    kernel = functools.partial(_transform_kernel, num_bases=B)
    block_bytes = (tile_n * d_in_p * 2          # x tile (bf16)
                   + K * d_in_p * d_out_p * 2   # resident weight slab (bf16)
                   + B * tile_n * d_out_p * 2   # H_bases tile (bf16)
                   + tile_n * d_out_p * 2)      # H_self tile (bf16)

    return pl.pallas_call(
        kernel,
        out_shape=(jax.ShapeDtypeStruct((B, N_p, d_out_p), jnp.bfloat16),
                   jax.ShapeDtypeStruct((N_p, d_out_p), jnp.bfloat16)),
        grid_spec=pltpu.PrefetchScalarGridSpec(
            num_scalar_prefetch=0,
            grid=(N_p // tile_n,),
            in_specs=[
                pl.BlockSpec((tile_n, d_in_p), lambda n: (n, 0)),      # x tile
                pl.BlockSpec((K, d_in_p, d_out_p), lambda n: (0, 0, 0)),  # W (resident)
            ],
            out_specs=(
                pl.BlockSpec((B, tile_n, d_out_p), lambda n: (0, n, 0)),
                pl.BlockSpec((tile_n, d_out_p), lambda n: (n, 0)),
            ),
        ),
        compiler_params=pltpu.CompilerParams(
            dimension_semantics=("parallel",),
            vmem_limit_bytes=_vmem_limit(block_bytes)),
    )(x, w_all)


# --------------------------------------------------------------------------- #
# Kernel 2: relational message passing   out = sum_r A_r @ (sum_b a[r,b] H_b) + H_self
# --------------------------------------------------------------------------- #
def _rel_spmm_kernel(alpha_ref, hb_ref, hself_ref, a_ref, o_ref, acc_ref,
                     *, num_bases, apply_relu):
    r = pl.program_id(1)
    j = pl.program_id(2)

    @pl.when(jnp.logical_and(r == 0, j == 0))
    def _():
        # Fold the self-loop term into the accumulator init (overlaps with the
        # A_0 DMA instead of being a serial epilogue matmul).
        acc_ref[...] = hself_ref[...].astype(jnp.float32)

    # Per-relation features for this j-tile: cheap VPU linear combination of
    # the precomputed basis activations (alpha scalars come from SMEM).
    h_r = alpha_ref[r, 0] * hb_ref[0].astype(jnp.float32)
    for b in range(1, num_bases):
        h_r = h_r + alpha_ref[r, b] * hb_ref[b].astype(jnp.float32)

    # Relation-wise message passing: (TI, TJ) @ (TJ, d_out) on the MXU, bf16
    # operands, f32 accumulation.
    acc_ref[...] += jnp.dot(a_ref[...], h_r.astype(jnp.bfloat16),
                            preferred_element_type=jnp.float32)

    @pl.when(jnp.logical_and(r == pl.num_programs(1) - 1,
                             j == pl.num_programs(2) - 1))
    def _():
        result = acc_ref[...]
        if apply_relu:
            result = jnp.maximum(result, 0.0)
        o_ref[...] = result.astype(o_ref.dtype)


def relational_spmm_pallas(alpha, h_bases, h_self, adj, *, apply_relu,
                           tile_i=128, tile_j=128):
    """alpha: (R, B) f32; h_bases: (B, N_p, d_out_p) bf16;
    h_self: (N_p, d_out_p) bf16; adj: (R, N_p, N_p) bf16.
    Returns (N_p, d_out_p) f32."""
    R, B = alpha.shape
    _, N_p, d_out_p = h_bases.shape

    kernel = functools.partial(_rel_spmm_kernel, num_bases=B,
                               apply_relu=apply_relu)

    block_bytes = (B * tile_j * d_out_p * 2    # H_bases tile (bf16)
                   + tile_i * d_out_p * 2      # H_self tile (bf16)
                   + tile_i * tile_j * 2       # A tile (bf16) -- dominant traffic
                   + tile_i * d_out_p * 4)     # output tile (f32)
    scratch_bytes = tile_i * d_out_p * 4       # f32 accumulator

    return pl.pallas_call(
        kernel,
        out_shape=jax.ShapeDtypeStruct((N_p, d_out_p), jnp.float32),
        grid_spec=pltpu.PrefetchScalarGridSpec(
            num_scalar_prefetch=0,
            grid=(N_p // tile_i, R, N_p // tile_j),
            in_specs=[
                pl.BlockSpec(memory_space=_SMEM_SPACE),               # alpha (R,B)
                pl.BlockSpec((B, tile_j, d_out_p),
                             lambda i, r, j: (0, j, 0)),              # H_bases[j]
                pl.BlockSpec((tile_i, d_out_p),
                             lambda i, r, j: (i, 0)),                 # H_self[i]
                pl.BlockSpec((_SQUEEZED, tile_i, tile_j),
                             lambda i, r, j: (r, i, j)),              # A[r,i,j]
            ],
            out_specs=pl.BlockSpec((tile_i, d_out_p),
                                   lambda i, r, j: (i, 0)),
            scratch_shapes=[pltpu.VMEM((tile_i, d_out_p), jnp.float32)],
        ),
        compiler_params=pltpu.CompilerParams(
            # Row-tile axis parallel (engages v7x's second TensorCore);
            # reduction axes (r, j) are last and "arbitrary".
            dimension_semantics=("parallel", "arbitrary", "arbitrary"),
            vmem_limit_bytes=_vmem_limit(block_bytes, scratch_bytes)),
    )(alpha, h_bases, h_self, adj)


# --------------------------------------------------------------------------- #
# Full forward
# --------------------------------------------------------------------------- #
def make_rgcn_params(key, in_feats, out_feats, num_layers, num_rels, num_bases):
    """Deterministic synthetic parameters matching RGCNLayer (basis regularizer,
    self_loop=True). Returns list of per-layer dicts."""
    shapes = [in_feats] + [out_feats] * num_layers
    params = []
    for i in range(num_layers):
        d_in, d_out = shapes[i], shapes[i + 1]
        key, k1, k2, k3 = jax.random.split(key, 4)
        scale = 1.0 / jnp.sqrt(jnp.float32(d_in))
        basis = jax.random.normal(k1, (num_bases, d_in, d_out), jnp.float32) * scale
        alpha = jax.random.normal(k2, (num_rels, num_bases), jnp.float32)
        w_self = jax.random.normal(k3, (d_in, d_out), jnp.float32) * scale
        params.append({"basis": basis, "alpha": alpha, "w_self": w_self})
    return params


def rgcn_forward(params, adj, x, *, tile_nodes=128):
    """Full RGCN forward (basis regularizer, self_loop=True, dropout=0 / eval).

    adj: (R, N, N) dense per-relation adjacency (A[r,i,j] = weight of edge
    j -> i of relation r); x: (N, in_feats).  Internally everything is
    zero-padded to lane/tile multiples and cast to bf16 (f32 accumulation).
    For real graphs use tile_nodes=512..1024 (v7x) / up to 2048 (v6e).
    """
    N, d0 = x.shape
    R = adj.shape[0]
    out_feats = params[-1]["basis"].shape[2]
    num_layers = len(params)

    N_p = _round_up(N, tile_nodes)
    d0_p = _round_up(d0, LANE)

    # Pad + cast once. Zero padding is inert: padded rows/cols stay zero.
    adj_p = jnp.zeros((R, N_p, N_p), jnp.bfloat16)
    adj_p = adj_p.at[:, :N, :N].set(adj.astype(jnp.bfloat16))
    h = jnp.zeros((N_p, d0_p), jnp.bfloat16)
    h = h.at[:N, :d0].set(x.astype(jnp.bfloat16))

    out = None
    for li, p in enumerate(params):
        basis, alpha, w_self = p["basis"], p["alpha"], p["w_self"]
        B, d_in, d_out = basis.shape
        d_in_p = _round_up(d_in, LANE)
        d_out_p = _round_up(d_out, LANE)
        assert h.shape == (N_p, d_in_p)

        # Stack the basis weights and the self-loop weight into one slab.
        w_all = jnp.zeros((B + 1, d_in_p, d_out_p), jnp.bfloat16)
        w_all = w_all.at[:B, :d_in, :d_out].set(basis.astype(jnp.bfloat16))
        w_all = w_all.at[B, :d_in, :d_out].set(w_self.astype(jnp.bfloat16))

        h_bases, h_self = transform_pallas(h, w_all, tile_n=tile_nodes)

        out = relational_spmm_pallas(
            alpha.astype(jnp.float32), h_bases, h_self, adj_p,
            apply_relu=(li < num_layers - 1),
            tile_i=tile_nodes, tile_j=tile_nodes)        # (N_p, d_out_p) f32
        h = out.astype(jnp.bfloat16)

    return out[:N, :out_feats]


def rgcn_forward_reference(params, adj, x):
    """Pure-JAX reference mirroring the kernel's bf16/f32 mixed precision."""
    adj_b = adj.astype(jnp.bfloat16)
    h = x.astype(jnp.bfloat16)
    num_layers = len(params)
    out = None
    for li, p in enumerate(params):
        basis = p["basis"].astype(jnp.bfloat16)
        w_self = p["w_self"].astype(jnp.bfloat16)
        alpha = p["alpha"].astype(jnp.float32)
        hb = jnp.einsum("nd,bde->bne", h, basis,
                        preferred_element_type=jnp.float32).astype(jnp.bfloat16)
        hs = jnp.einsum("nd,de->ne", h, w_self,
                        preferred_element_type=jnp.float32).astype(jnp.bfloat16)
        # f32 linear combination of basis activations, then bf16 SpMM operand
        h_rel = jnp.sum(alpha[:, :, None, None] *
                        hb.astype(jnp.float32)[None, :, :, :],
                        axis=1).astype(jnp.bfloat16)
        msg = jnp.einsum("rij,rjd->id", adj_b, h_rel,
                         preferred_element_type=jnp.float32)
        out = msg + hs.astype(jnp.float32)
        if li < num_layers - 1:
            out = jax.nn.relu(out)
        h = out.astype(jnp.bfloat16)
    return out


if __name__ == "__main__":
    # Small shapes; N deliberately not a multiple of 128 to exercise padding.
    N = 200
    in_feats = 32
    out_feats = 32
    num_layers = 2
    num_rels = 4
    num_bases = 2

    key = jax.random.PRNGKey(0)
    key, kx, ka, kw, kp = jax.random.split(key, 5)

    # Node features.
    x = jax.random.normal(kx, (N, in_feats), jnp.float32)

    # Dense per-relation adjacency: sparse Bernoulli mask * random edge weights.
    mask = (jax.random.uniform(ka, (num_rels, N, N)) < 0.1).astype(jnp.float32)
    wgt = jax.random.uniform(kw, (num_rels, N, N), jnp.float32)
    adj = mask * wgt

    params = make_rgcn_params(kp, in_feats, out_feats, num_layers,
                              num_rels, num_bases)

    out = rgcn_forward(params, adj, x)
    out = jax.block_until_ready(out)

    ref = rgcn_forward_reference(params, adj, x)
    ref = jax.block_until_ready(ref)

    assert out.shape == (N, out_feats)
    max_err = float(jnp.max(jnp.abs(out - ref)))
    assert jnp.allclose(out, ref, atol=5e-2, rtol=5e-2), (
        f"mismatch vs reference, max abs err {max_err}")

    print("KERNEL_OK")
</pallas_src>

<mosaic_0001>
module attributes {stable_mosaic.version = 11 : i64} {
  func.func @_transform_kernel(%arg0: i32, %arg1: memref<128x128xbf16, #tpu.memory_space<vmem>>, %arg2: memref<3x128x128xbf16, #tpu.memory_space<vmem>>, %arg3: memref<2x128x128xbf16, #tpu.memory_space<vmem>>, %arg4: memref<128x128xbf16, #tpu.memory_space<vmem>>) attributes {dimension_semantics = [#tpu.dimension_semantics<parallel>], iteration_bounds = array<i64: 2>, scalar_prefetch = 0 : i64, scratch_operands = 0 : i64, tpu.core_type = #tpu.core_type<tc>, window_params = [{transform_indices = @transform_0, window_bounds = array<i64: 128, 128>}, {pipeline_mode = #tpu.pipeline_mode<synchronous>, transform_indices = @transform_1, window_bounds = array<i64: 3, 128, 128>}, {transform_indices = @transform_2, window_bounds = array<i64: 2, 128, 128>}, {transform_indices = @transform_3, window_bounds = array<i64: 128, 128>}]} {
    %c0 = arith.constant 0 : index
    %c0_0 = arith.constant 0 : index
    %0 = vector.load %arg1[%c0, %c0_0] : memref<128x128xbf16, #tpu.memory_space<vmem>>, vector<128x128xbf16>
    %c0_1 = arith.constant 0 : index
    %c0_2 = arith.constant 0 : index
    %c0_3 = arith.constant 0 : index
    %1 = vector.load %arg2[%c0_1, %c0_2, %c0_3] : memref<3x128x128xbf16, #tpu.memory_space<vmem>>, vector<1x128x128xbf16>
    %2 = vector.shape_cast %1 : vector<1x128x128xbf16> to vector<128x128xbf16>
    %cst = arith.constant dense<0.000000e+00> : vector<128x128xf32>
    %3 = tpu.matmul %0, %2, %cst {dimension_numbers = #tpu.dot_dimension_numbers<[1], [0], [0], [1], [0, 0, 1, 1], [], []>} : vector<128x128xbf16>, vector<128x128xbf16>, vector<128x128xf32> -> vector<128x128xf32>
    %4 = arith.truncf %3 : vector<128x128xf32> to vector<128x128xbf16>
    %c0_4 = arith.constant 0 : index
    %c0_5 = arith.constant 0 : index
    %c0_6 = arith.constant 0 : index
    %5 = vector.load %arg3[%c0_4, %c0_5, %c0_6] : memref<2x128x128xbf16, #tpu.memory_space<vmem>>, vector<1x128x128xbf16>
    %6 = vector.shape_cast %5 : vector<1x128x128xbf16> to vector<128x128xbf16>
    %7 = vector.shape_cast %4 : vector<128x128xbf16> to vector<1x128x128xbf16>
    tpu.vector_store %arg3[%c0_4, %c0_5, %c0_6], %7 {strides = array<i32>} : memref<2x128x128xbf16, #tpu.memory_space<vmem>>, vector<1x128x128xbf16>,
    %c1 = arith.constant 1 : index
    %c0_7 = arith.constant 0 : index
    %c0_8 = arith.constant 0 : index
    %8 = vector.load %arg2[%c1, %c0_7, %c0_8] : memref<3x128x128xbf16, #tpu.memory_space<vmem>>, vector<1x128x128xbf16>
    %9 = vector.shape_cast %8 : vector<1x128x128xbf16> to vector<128x128xbf16>
    %cst_9 = arith.constant dense<0.000000e+00> : vector<128x128xf32>
    %10 = tpu.matmul %0, %9, %cst_9 {dimension_numbers = #tpu.dot_dimension_numbers<[1], [0], [0], [1], [0, 0, 1, 1], [], []>} : vector<128x128xbf16>, vector<128x128xbf16>, vector<128x128xf32> -> vector<128x128xf32>
    %11 = arith.truncf %10 : vector<128x128xf32> to vector<128x128xbf16>
    %c1_10 = arith.constant 1 : index
    %c0_11 = arith.constant 0 : index
    %c0_12 = arith.constant 0 : index
    %12 = vector.load %arg3[%c1_10, %c0_11, %c0_12] : memref<2x128x128xbf16, #tpu.memory_space<vmem>>, vector<1x128x128xbf16>
    %13 = vector.shape_cast %12 : vector<1x128x128xbf16> to vector<128x128xbf16>
    %14 = vector.shape_cast %11 : vector<128x128xbf16> to vector<1x128x128xbf16>
    tpu.vector_store %arg3[%c1_10, %c0_11, %c0_12], %14 {strides = array<i32>} : memref<2x128x128xbf16, #tpu.memory_space<vmem>>, vector<1x128x128xbf16>,
    %c2 = arith.constant 2 : index
    %c0_13 = arith.constant 0 : index
    %c0_14 = arith.constant 0 : index
    %15 = vector.load %arg2[%c2, %c0_13, %c0_14] : memref<3x128x128xbf16, #tpu.memory_space<vmem>>, vector<1x128x128xbf16>
    %16 = vector.shape_cast %15 : vector<1x128x128xbf16> to vector<128x128xbf16>
    %cst_15 = arith.constant dense<0.000000e+00> : vector<128x128xf32>
    %17 = tpu.matmul %0, %16, %cst_15 {dimension_numbers = #tpu.dot_dimension_numbers<[1], [0], [0], [1], [0, 0, 1, 1], [], []>} : vector<128x128xbf16>, vector<128x128xbf16>, vector<128x128xf32> -> vector<128x128xf32>
    %18 = arith.truncf %17 : vector<128x128xf32> to vector<128x128xbf16>
    %c0_16 = arith.constant 0 : index
    %c0_17 = arith.constant 0 : index
    %19 = vector.load %arg4[%c0_16, %c0_17] : memref<128x128xbf16, #tpu.memory_space<vmem>>, vector<128x128xbf16>
    tpu.vector_store %arg4[%c0_16, %c0_17], %18 {strides = array<i32>} : memref<128x128xbf16, #tpu.memory_space<vmem>>, vector<128x128xbf16>,
    return
  }
  func.func @transform_0(%arg0: i32) -> (i32, i32) {
    %c0_i32 = arith.constant 0 : i32
    %c0_i32_0 = arith.constant 0 : i32
    return %arg0, %c0_i32 : i32, i32
  }
  func.func @transform_1(%arg0: i32) -> (i32, i32, i32) {
    %c0_i32 = arith.constant 0 : i32
    %c0_i32_0 = arith.constant 0 : i32
    %c0_i32_1 = arith.constant 0 : i32
    %c0_i32_2 = arith.constant 0 : i32
    return %c0_i32, %c0_i32_0, %c0_i32_1 : i32, i32, i32
  }
  func.func @transform_2(%arg0: i32) -> (i32, i32, i32) {
    %c0_i32 = arith.constant 0 : i32
    %c0_i32_0 = arith.constant 0 : i32
    %c0_i32_1 = arith.constant 0 : i32
    return %c0_i32, %arg0, %c0_i32_0 : i32, i32, i32
  }
  func.func @transform_3(%arg0: i32) -> (i32, i32) {
    %c0_i32 = arith.constant 0 : i32
    %c0_i32_0 = arith.constant 0 : i32
    return %arg0, %c0_i32 : i32, i32
  }
}

</mosaic_0001>

<bundles_post_ra>
// kernel: tpu_custom_call.1
= control target key start
LH: loop header
LB: loop body
LE: loop exit
PB: predicated region body
PF: predicated region fallthrough
CT: control target
= control target key end

     0   :  { %9 = vsyncpa [#allocation3], 0  ;;  %s1734_s0 = inlined_call_operand.hbm [shape: bf16[256,128], index: 0, kind: input, shape index: {}]   ;;  %s1735_s1 = inlined_call_operand.hbm [shape: bf16[3,128,128], index: 1, kind: input, shape index: {}]   ;;  %s1736_s2 = inlined_call_operand.hbm [shape: bf16[2,256,128], index: 2, kind: output, shape index: {0}]   ;;  %s1737_s3 = inlined_call_operand.hbm [shape: bf16[256,128], index: 3, kind: output, shape index: {1}]  }
   0x1   :  { %11 = vsyncpa [#allocation3 + $0x1], 0 }
   0x2   :  { %12 = vsyncpa [#allocation6], 0 }
   0x3   :  { %13 = vsyncpa [#allocation4], 0 }
   0x4   :  { %15 = vsyncpa [#allocation4 + $0x1], 0 }
   0x5   :  { %16 = vsyncpa [#allocation9], 0 }
   0x6   :  { %18 = vsyncpa [#allocation9 + $0x1], 0  ;;  %s1513_s12 = smov 0   ;;  %s1515_s13 = smov 0  }
   0x7   :  { %s1517_s14 = smov 0   ;;  %s1519_s15 = smov 0  }
   0x8 LB: > { %s1534_s16 = sadd.s32 4294967295, %s1479_s15   ;;  %s901_s17 = sadd.s32 4294967294, %s1479_s15   ;;  %s1479_s15 = sphi %s1519_s15, %s1747_s15   ;;  %s1475_s14 = sphi %s1517_s14, %s1746_s14   ;;  %s1471_s13 = sphi %s1515_s13, %s1745_s13   ;;  %s1467_s12 = sphi %s1513_s12, %s1744_s12  }
   0x9   : > { %p44_p0 = scmp.ne.s32.totalorder %s1471_s13, %s1467_s12  ;;  %p45_p1 = scmp.eq.s32.totalorder %s1534_s16, 0 }
   0xa   : > { %p89_p2 = scmp.eq.s32.totalorder %s1534_s16, 1  ;;  %p95_p3 = scmp.eq.s32.totalorder %s901_s17, 1 }
   0xb   : > { %p1543_p4 = por %p45_p1, %p44_p0  ;;  %p902_p5 = scmp.ge.s32.totalorder %s1479_s15, 1 }
   0xc   : > { %p1548_p6 = por %p95_p3, %p44_p0  ;;  %p128_p7 = scmp.lt.s32.totalorder %s1479_s15, 3 }
   0xd   : > { %s139_s22 = sshll.u32 %s1735_s1, 4  ;;  %s1481_s24 = smov [#allocation5]   ;;  %s140_s22 = int_to_ptr.hbm [resolvable:$true] %s139_s22 }
   0xe   : > { %p1556_p8 = pnand %p902_p5, %p128_p7  ;;  %s141_s25 = sshll.u32 %s1481_s24, 4  ;;  %s142_s25 = int_to_ptr.vmem [resolvable:$true] %s141_s25 }
   0xf   : > { %s1566_s26 = sadd.s32 1, %s1479_s15   ;;  %s1482_s27 = smov 64  }
  0x10   : > { %p1282_p9 = pneg %p1556_p8  ;;  %s1483_s28 = smov 4  }
  0x11   : > { %s28_s29 = ssub.s32 %s1479_s15, %s1566_s26  ;;  %s31_s30 = sadd.s32 1, %s1475_s14 }
  0x12   : > { %p1283_p10 = pnand %p1282_p9, %p45_p1  ;;  %p29_p12 = scmp.eq.s32.totalorder %s28_s29, 0 }
  0x13   : > { %p38_p13 = scmp.ne.s32.totalorder %s1475_s14, %s1471_s13  ;;  %p39_p0 = scmp.eq.s32.totalorder %s1479_s15, 0 }
  0x14   : > { %1285 = dma.hbm_to_vmem [thread:$0]  (!%p1283_p10), %s140_s22, 3072, %s142_s25, [#allocation6], %s1482_s27, %s1482_s27, %s1483_s28  }
  0x15   : > { %s1578_s4 = scalar_select %p29_p12, %s1475_s14, %s31_s30  }
  0x16   : > { %p1582_p3 = por %p89_p2, %p38_p13  ;;  %p1298_p5 = scmp.lt.s32.totalorder %s1479_s15, 2 }
  0x17   : > { %s155_s6 = sand.u32 1, %s1475_s14   ;;  %s1065_s7 = sshll.u32 %s1479_s15, 6 }
  0x18   : > { %p40_p7 = por %p39_p0, %p38_p13  ;;  %s905_s8 = sshll.u32 %s155_s6, 6 }
  0x19   : > { %s164_s11 = scalar_lea.hbm %s1734_s0, %s1065_s7  ;;  %s159_s20 = scalar_lea.vmem [#allocation2], %s905_s8 }
  0x1a   : > { %s165_s17 = sshll.u32 %s164_s11, 4  ;;  %s167_s21 = sshll.u32 %s159_s20, 4  ;;  %s166_s17 = int_to_ptr.hbm [resolvable:$true] %s165_s17  ;;  %s168_s21 = int_to_ptr.vmem [resolvable:$true] %s167_s21 }
  0x1b   : > { %p1592_p9 = pnand %p1298_p5, %p40_p7  ;;  %s156_s24 = scalar_lea.sflag [#allocation3], %s155_s6 }
  0x1c   : > { %s1375_s25 = sshra.s32 %s166_s17, 4  ;;  %s1382_s8 = scalar_lea.hbm %s1734_s0, 128  ;;  %s1376_s25 = int_to_ptr.hbm [resolvable:$true] %s1375_s25 }
  0x1d   : > { %s1377_s29 = scalar_lea.hbm %s1376_s25, 64  ;;  %p1379_p10 = pneg %p1592_p9 }
  0x1e   : > { %p1378_p2 = scmp.ne.s32.totalorder %s1376_s25, %s1377_s29  ;;  %p1383_p0 = scmp.lt.s32.totalorder %s1376_s25, %s1734_s0 }
  0x1f   : > { %p1384_p5 = scmp.lt.s32.totalorder %s1382_s8, %s1377_s29 }
  0x20   : > { %p1380_p12 = pnand %p1379_p10, %p1378_p2 }
  0x21   : > { %p1385_p7 = por %p1384_p5, %p1383_p0 }
  0x22   : > { %p1381_p13 = pneg %p1380_p12 }
  0x24   : > { %p1386_p11 = pnand %p1385_p7, %p1381_p13 }
  0x26   : > { %1389 = shalt.err (!%p1386_p11)
}
  0x27   : > { %1289 = dma.hbm_to_vmem [thread:$0]  (!%p1592_p9), %s166_s17, 1024, %s168_s21, %s156_s24, %s1482_s27, %s1482_s27, %s1483_s28  }
  0x28   : > { %179 = sbr.rel (%p1556_p8) target bundleno = 329 (0x149), region = 28  ;;  %s1612_s6 = sand.u32 (!%p1556_p8), 1, %s1471_s13  }
  0x29   : > { %s909_s11 = sshll.u32 (!%p1556_p8), %s1612_s6, 6  ;;  %s182_s20 = scalar_lea.sflag (!%p1556_p8), [#allocation3], %s1612_s6 }
  0x2a   : > { %s1618_s25 = scalar_lea.vmem (!%p1556_p8), [#allocation2], %s909_s11 }
  0x2d   : > { %1450 = dma.done.wait (%p1543_p4), %s182_s20, 1024  }
  0x2e   : > { %1452 = vsyncadd (%p1543_p4), %s182_s20, 4294966272 }
  0x2f   : > { %1454 = dma.done.wait (%p45_p1), [#allocation6], 3072  }
  0x30   : > { %1456 = vsyncadd (%p45_p1), [#allocation6], 4294964224  ;;  %v1081_v0 = vld [vmem:[#allocation5 + $0x38] sm:$0xff]  ;;  %v1080_v3 = vld [vmem:[#allocation5 + $0x30] sm:$0xff]  ;;  %s911_s18 = sshll.u32 %s1612_s6, 7  ;;  %s1656_s27 = scalar_lea.vmem [#allocation8], %s909_s11 }
  0x31   : > { %v1089_v1 = vld [vmem:[#allocation5 + $0x78] sm:$0xff]  ;;  %350 = vmatpush.bf16.msra.mxu0 %v1081_v0  ;;  %1242 = vmatpush.bf16.msra.mxu3 %v1081_v0  ;;  %v1088_v4 = vld [vmem:[#allocation5 + $0x70] sm:$0xff]  ;;  %v1079_v6 = vld [vmem:[#allocation5 + $0x28] sm:$0xff]  ;;  %s1649_s23 = scalar_lea.vmem [#allocation7], %s911_s18  ;;  %s725_s28 = scalar_lea.sflag [#allocation4], %s1612_s6 }
  0x32   : > { %v1628_v2 = vld [vmem:[#allocation5 + $0xb8] sm:$0xff]  ;;  %496 = vmatpush.bf16.msra.mxu1 %v1089_v1  ;;  %v1631_v5 = vld [vmem:[#allocation5 + $0xb0] sm:$0xff]  ;;  %v1087_v7 = vld [vmem:[#allocation5 + $0x68] sm:$0xff]  ;;  %s730_s17 = scalar_lea.sflag [#allocation9], %s1612_s6 }
  0x33   : > { %643 = vmatpush.bf16.msra.mxu2 %v1628_v2  ;;  %v1634_v8 = vld [vmem:[#allocation5 + $0xa8] sm:$0xff]  ;;  %v1078_v9 = vld [vmem:[#allocation5 + $0x20] sm:$0xff]  ;;  %v1077_v12 = vld [vmem:[#allocation5 + $0x18] sm:$0xff] }
  0x34   : > { %v1086_v10 = vld [vmem:[#allocation5 + $0x60] sm:$0xff]  ;;  %v1085_v13 = vld [vmem:[#allocation5 + $0x58] sm:$0xff]  ;;  %v1076_v15 = vld [vmem:[#allocation5 + $0x10] sm:$0xff] }
  0x35   : > { %351 = vmatpush.bf16.msra.mxu0 %v1080_v3  ;;  %1243 = vmatpush.bf16.msra.mxu3 %v1080_v3  ;;  %v1094_v11 = vld [vmem:[#allocation5 + $0xa0] sm:$0xff]  ;;  %v1093_v14 = vld [vmem:[#allocation5 + $0x98] sm:$0xff]  ;;  %v1084_v16 = vld [vmem:[#allocation5 + $0x50] sm:$0xff] }
  0x36   : > { %497 = vmatpush.bf16.msra.mxu1 %v1088_v4  ;;  %v1092_v17 = vld [vmem:[#allocation5 + $0x90] sm:$0xff]  ;;  %v1075_v18 = vld [vmem:[#allocation5 + $0x8] sm:$0xff]  ;;  %v1074_v21 = vld [vmem:[#allocation5] sm:$0xff] }
  0x37   : > { %644 = vmatpush.bf16.msra.mxu2 %v1631_v5  ;;  %v1083_v19 = vld [vmem:[#allocation5 + $0x48] sm:$0xff]  ;;  %v1082_v22 = vld [vmem:[#allocation5 + $0x40] sm:$0xff]  ;;  %v1072_v25 = vld [vmem:[%s1618_s25 + $0x30] sm:$0xff] }
  0x38   : > { %v1091_v20 = vld [vmem:[#allocation5 + $0x88] sm:$0xff]  ;;  %v1090_v23 = vld [vmem:[#allocation5 + $0x80] sm:$0xff]  ;;  %v1073_v27 = vld [vmem:[%s1618_s25 + $0x38] sm:$0xff] }
  0x39   : > { %352 = vmatpush.bf16.msra.mxu0 %v1079_v6  ;;  %1244 = vmatpush.bf16.msra.mxu3 %v1079_v6  ;;  %v1066_v24 = vld [vmem:[%s1618_s25] sm:$0xff]  ;;  %v1067_v26 = vld [vmem:[%s1618_s25 + $0x8] sm:$0xff]  ;;  %v1068_v28 = vld [vmem:[%s1618_s25 + $0x10] sm:$0xff] }
  0x3a   : > { %498 = vmatpush.bf16.msra.mxu1 %v1087_v7  ;;  %v1069_v29 = vld [vmem:[%s1618_s25 + $0x18] sm:$0xff]  ;;  %v1070_v30 = vld [vmem:[%s1618_s25 + $0x20] sm:$0xff]  ;;  %v1071_v31 = vld [vmem:[%s1618_s25 + $0x28] sm:$0xff] }
  0x3b   : > { %645 = vmatpush.bf16.msra.mxu2 %v1634_v8 }
  0x3d   : > { %353 = vmatpush.bf16.msra.mxu0 %v1078_v9  ;;  %1245 = vmatpush.bf16.msra.mxu3 %v1078_v9 }
  0x3e   : > { %499 = vmatpush.bf16.msra.mxu1 %v1086_v10 }
  0x3f   : > { %646 = vmatpush.bf16.msra.mxu2 %v1094_v11 }
  0x41   : > { %354 = vmatpush.bf16.msra.mxu0 %v1077_v12  ;;  %1246 = vmatpush.bf16.msra.mxu3 %v1077_v12 }
  0x42   : > { %500 = vmatpush.bf16.msra.mxu1 %v1085_v13 }
  0x43   : > { %647 = vmatpush.bf16.msra.mxu2 %v1093_v14 }
  0x45   : > { %355 = vmatpush.bf16.msra.mxu0 %v1076_v15  ;;  %1247 = vmatpush.bf16.msra.mxu3 %v1076_v15 }
  0x46   : > { %501 = vmatpush.bf16.msra.mxu1 %v1084_v16 }
  0x47   : > { %648 = vmatpush.bf16.msra.mxu2 %v1092_v17 }
  0x49   : > { %356 = vmatpush.bf16.msra.mxu0 %v1075_v18  ;;  %1248 = vmatpush.bf16.msra.mxu3 %v1075_v18 }
  0x4a   : > { %502 = vmatpush.bf16.msra.mxu1 %v1083_v19 }
  0x4b   : > { %649 = vmatpush.bf16.msra.mxu2 %v1091_v20 }
  0x4d   : > { %357 = vmatpush.bf16.msra.mxu0 %v1074_v21  ;;  %1249 = vmatpush.bf16.msra.mxu3 %v1074_v21 }
  0x4e   : > { %503 = vmatpush.bf16.msra.mxu1 %v1082_v22 }
  0x4f   : > { %650 = vmatpush.bf16.msra.mxu2 %v1090_v23 }
  0x50   : > { %358 = vmatmul.bf16.vlgmr.msra.gmra.mxu0 %v1066_v24  ;;  %388 = vmatmul.bf16.vlgmr.msra.gmra.mxu3 %v1072_v25 }
  0x51   : > { %1250 = vmatpush.bf16.msrb.mxu3 %v1089_v1  ;;  %504 = vmatmul.bf16.vlgmr.msra.gmra.mxu1 %v1066_v24 }
  0x52   : > { %651 = vmatmul.bf16.vlgmr.msra.gmra.mxu2 %v1066_v24 }
  0x55   : > { %1251 = vmatpush.bf16.msrb.mxu3 %v1088_v4 }
  0x59   : > { %1252 = vmatpush.bf16.msrb.mxu3 %v1087_v7 }
  0x5d   : > { %1253 = vmatpush.bf16.msrb.mxu3 %v1086_v10 }
  0x60   : > { %363 = vmatmul.bf16.gmra.mxu0 %v1067_v26  ;;  %393 = vmatmul.bf16.gmra.mxu3 %v1073_v27 }
  0x61   : > { %1254 = vmatpush.bf16.msrb.mxu3 %v1085_v13  ;;  %509 = vmatmul.bf16.gmra.mxu1 %v1067_v26 }
  0x62   : > { %656 = vmatmul.bf16.gmra.mxu2 %v1067_v26 }
  0x65   : > { %1255 = vmatpush.bf16.msrb.mxu3 %v1084_v16 }
  0x69   : > { %1256 = vmatpush.bf16.msrb.mxu3 %v1083_v19 }
  0x6d   : > { %1257 = vmatpush.bf16.msrb.mxu3 %v1082_v22 }
  0x70   : > { %368 = vmatmul.bf16.gmra.mxu0 %v1068_v28  ;;  %534 = vmatmul.bf16.vlgmr.msrb.gmra.mxu3 %v1072_v25 }
  0x71   : > { %1258 = vmatpush.bf16.msra.mxu3 %v1628_v2  ;;  %514 = vmatmul.bf16.gmra.mxu1 %v1068_v28 }
  0x72   : > { %661 = vmatmul.bf16.gmra.mxu2 %v1068_v28 }
  0x75   : > { %1259 = vmatpush.bf16.msra.mxu3 %v1631_v5 }
  0x79   : > { %1260 = vmatpush.bf16.msra.mxu3 %v1634_v8 }
  0x7d   : > { %1261 = vmatpush.bf16.msra.mxu3 %v1094_v11 }
  0x80   : > { %373 = vmatmul.bf16.gmra.mxu0 %v1069_v29  ;;  %539 = vmatmul.bf16.gmra.mxu3 %v1073_v27 }
  0x81   : > { %1262 = vmatpush.bf16.msra.mxu3 %v1093_v14  ;;  %519 = vmatmul.bf16.gmra.mxu1 %v1069_v29 }
  0x82   : > { %666 = vmatmul.bf16.gmra.mxu2 %v1069_v29 }
  0x85   : > { %1263 = vmatpush.bf16.msra.mxu3 %v1092_v17 }
  0x89   : > { %1264 = vmatpush.bf16.msra.mxu3 %v1091_v20 }
  0x8d   : > { %1265 = vmatpush.bf16.msra.mxu3 %v1090_v23 }
  0x90   : > { %378 = vmatmul.bf16.gmra.mxu0 %v1070_v30  ;;  %681 = vmatmul.bf16.vlgmr.msra.gmra.mxu3 %v1072_v25 }
  0x91   : > { %524 = vmatmul.bf16.gmra.mxu1 %v1070_v30 }
  0x92   : > { %671 = vmatmul.bf16.gmra.mxu2 %v1070_v30 }
  0xa0   : > { %383 = vmatmul.bf16.gmra.mxu0 %v1071_v31  ;;  %686 = vmatmul.bf16.gmra.mxu3 %v1073_v27 }
  0xa1   : > { %529 = vmatmul.bf16.gmra.mxu1 %v1071_v31 }
  0xa2   : > { %676 = vmatmul.bf16.gmra.mxu2 %v1071_v31 }
  0xcd   : > { %v359_v32 = vpop.f32.mrf.mxu0 }
  0xce   : > { %v505_v33 = vpop.f32.mrf.mxu1 }
  0xd3   : > { %v389_v34 = vpop.f32.mrf.mxu3 }
  0xd5   : > { %v652_v35 = vpop.f32.mrf.mxu2  ;;  %v361_v36 = vpop.f32.mrf.mxu0 }
  0xd6   : > { %v1103_v37 = vpack.c.bf16 %v361_v36, %v359_v32  ;;  %v507_v38 = vpop.f32.mrf.mxu1 }
  0xd7   : > { %v1143_v39 = vpack.c.bf16 %v507_v38, %v505_v33 }
  0xd8   : > { %1104 = vst [vmem:[%s1649_s23] sm:$0xff] %v1103_v37  }
  0xd9   : > { %1227 = vst [vmem:[%s1649_s23 + $0x40] sm:$0xff] %v1143_v39  }
  0xdb   : > { %v391_v40 = vpop.f32.mrf.mxu3 }
  0xdc   : > { %v1133_v41 = vpack.c.bf16 %v391_v40, %v389_v34 }
  0xdd   : > { %v654_v42 = vpop.f32.mrf.mxu2  ;;  %v364_v44 = vpop.f32.mrf.mxu0 }
  0xde   : > { %v1183_v43 = vpack.c.bf16 %v654_v42, %v652_v35  ;;  %1225 = vst [vmem:[%s1649_s23 + $0x30] sm:$0xff] %v1133_v41   ;;  %v510_v45 = vpop.f32.mrf.mxu1 }
  0xe0   : > { %1184 = vst [vmem:[%s1656_s27] sm:$0xff] %v1183_v43  }
  0xe3   : > { %v394_v46 = vpop.f32.mrf.mxu3 }
  0xe5   : > { %v657_v47 = vpop.f32.mrf.mxu2  ;;  %v366_v48 = vpop.f32.mrf.mxu0 }
  0xe6   : > { %v1108_v49 = vpack.c.bf16 %v366_v48, %v364_v44  ;;  %v512_v50 = vpop.f32.mrf.mxu1 }
  0xe7   : > { %v1148_v51 = vpack.c.bf16 %v512_v50, %v510_v45 }
  0xe8   : > { %1220 = vst [vmem:[%s1649_s23 + $0x8] sm:$0xff] %v1108_v49  }
  0xe9   : > { %1228 = vst [vmem:[%s1649_s23 + $0x48] sm:$0xff] %v1148_v51  }
  0xeb   : > { %v396_v52 = vpop.f32.mrf.mxu3 }
  0xec   : > { %v1138_v53 = vpack.c.bf16 %v396_v52, %v394_v46 }
  0xed   : > { %v659_v54 = vpop.f32.mrf.mxu2  ;;  %v369_v56 = vpop.f32.mrf.mxu0 }
  0xee   : > { %v1188_v55 = vpack.c.bf16 %v659_v54, %v657_v47  ;;  %1226 = vst [vmem:[%s1649_s23 + $0x38] sm:$0xff] %v1138_v53   ;;  %v515_v57 = vpop.f32.mrf.mxu1 }
  0xf0   : > { %1235 = vst [vmem:[%s1656_s27 + $0x8] sm:$0xff] %v1188_v55  }
  0xf3   : > { %v535_v58 = vpop.f32.mrf.mxu3 }
  0xf5   : > { %v662_v59 = vpop.f32.mrf.mxu2  ;;  %v371_v60 = vpop.f32.mrf.mxu0 }
  0xf6   : > { %v1113_v61 = vpack.c.bf16 %v371_v60, %v369_v56  ;;  %v517_v62 = vpop.f32.mrf.mxu1 }
  0xf7   : > { %v1153_v63 = vpack.c.bf16 %v517_v62, %v515_v57 }
  0xf8   : > { %1221 = vst [vmem:[%s1649_s23 + $0x10] sm:$0xff] %v1113_v61  }
  0xf9   : > { %1229 = vst [vmem:[%s1649_s23 + $0x50] sm:$0xff] %v1153_v63  }
  0xfb   : > { %v537_v0 = vpop.f32.mrf.mxu3 }
  0xfc   : > { %v1173_v1 = vpack.c.bf16 %v537_v0, %v535_v58 }
  0xfd   : > { %v664_v2 = vpop.f32.mrf.mxu2  ;;  %v374_v4 = vpop.f32.mrf.mxu0 }
  0xfe   : > { %v1193_v3 = vpack.c.bf16 %v664_v2, %v662_v59  ;;  %1233 = vst [vmem:[%s1649_s23 + $0x70] sm:$0xff] %v1173_v1   ;;  %v520_v5 = vpop.f32.mrf.mxu1 }
 0x100   : > { %1236 = vst [vmem:[%s1656_s27 + $0x10] sm:$0xff] %v1193_v3  }
 0x103   : > { %v540_v6 = vpop.f32.mrf.mxu3 }
 0x105   : > { %v667_v7 = vpop.f32.mrf.mxu2  ;;  %v376_v8 = vpop.f32.mrf.mxu0 }
 0x106   : > { %v1118_v9 = vpack.c.bf16 %v376_v8, %v374_v4  ;;  %v522_v10 = vpop.f32.mrf.mxu1 }
 0x107   : > { %v1158_v11 = vpack.c.bf16 %v522_v10, %v520_v5 }
 0x108   : > { %1222 = vst [vmem:[%s1649_s23 + $0x18] sm:$0xff] %v1118_v9  }
 0x109   : > { %1230 = vst [vmem:[%s1649_s23 + $0x58] sm:$0xff] %v1158_v11  }
 0x10b   : > { %v542_v12 = vpop.f32.mrf.mxu3 }
 0x10c   : > { %v1178_v13 = vpack.c.bf16 %v542_v12, %v540_v6 }
 0x10d   : > { %v669_v14 = vpop.f32.mrf.mxu2  ;;  %v379_v16 = vpop.f32.mrf.mxu0 }
 0x10e   : > { %v1198_v15 = vpack.c.bf16 %v669_v14, %v667_v7  ;;  %1234 = vst [vmem:[%s1649_s23 + $0x78] sm:$0xff] %v1178_v13   ;;  %v525_v17 = vpop.f32.mrf.mxu1 }
 0x110   : > { %1237 = vst [vmem:[%s1656_s27 + $0x18] sm:$0xff] %v1198_v15  }
 0x113   : > { %v682_v18 = vpop.f32.mrf.mxu3 }
 0x115   : > { %v672_v19 = vpop.f32.mrf.mxu2  ;;  %v381_v20 = vpop.f32.mrf.mxu0 }
 0x116   : > { %v1123_v21 = vpack.c.bf16 %v381_v20, %v379_v16  ;;  %v527_v22 = vpop.f32.mrf.mxu1 }
 0x117   : > { %v1163_v23 = vpack.c.bf16 %v527_v22, %v525_v17 }
 0x118   : > { %1223 = vst [vmem:[%s1649_s23 + $0x20] sm:$0xff] %v1123_v21  }
 0x119   : > { %1231 = vst [vmem:[%s1649_s23 + $0x60] sm:$0xff] %v1163_v23  }
 0x11b   : > { %v684_v24 = vpop.f32.mrf.mxu3 }
 0x11c   : > { %v1213_v26 = vpack.c.bf16 %v684_v24, %v682_v18 }
 0x11d   : > { %v674_v25 = vpop.f32.mrf.mxu2  ;;  %v384_v28 = vpop.f32.mrf.mxu0 }
 0x11e   : > { %v1203_v27 = vpack.c.bf16 %v674_v25, %v672_v19  ;;  %1240 = vst [vmem:[%s1656_s27 + $0x30] sm:$0xff] %v1213_v26   ;;  %v530_v29 = vpop.f32.mrf.mxu1 }
 0x120   : > { %1238 = vst [vmem:[%s1656_s27 + $0x20] sm:$0xff] %v1203_v27  }
 0x123   : > { %v687_v30 = vpop.f32.mrf.mxu3 }
 0x125   : > { %v677_v31 = vpop.f32.mrf.mxu2  ;;  %v386_v32 = vpop.f32.mrf.mxu0 }
 0x126   : > { %v1128_v33 = vpack.c.bf16 %v386_v32, %v384_v28  ;;  %v532_v34 = vpop.f32.mrf.mxu1 }
 0x127   : > { %v1168_v35 = vpack.c.bf16 %v532_v34, %v530_v29 }
 0x128   : > { %1224 = vst [vmem:[%s1649_s23 + $0x28] sm:$0xff] %v1128_v33  }
 0x129   : > { %1232 = vst [vmem:[%s1649_s23 + $0x68] sm:$0xff] %v1168_v35  }
 0x12b   : > { %v689_v36 = vpop.f32.mrf.mxu3 }
 0x12c   : > { %v1218_v38 = vpack.c.bf16 %v689_v36, %v687_v30 }
 0x12d   : > { %v679_v37 = vpop.f32.mrf.mxu2 }
 0x12e   : > { %v1208_v39 = vpack.c.bf16 %v679_v37, %v677_v31  ;;  %1241 = vst [vmem:[%s1656_s27 + $0x38] sm:$0xff] %v1218_v38  }
 0x130   : > { %1239 = vst [vmem:[%s1656_s27 + $0x28] sm:$0xff] %v1208_v39  }
 0x131   : > { %s1098_s21 = sshll.u32 %s1534_s16, 6  ;;  %s752_s22 = sshll.u32 %s1649_s23, 4  ;;  %s753_s22 = int_to_ptr.vmem [resolvable:$true] %s752_s22 }
 0x132   : > { %s741_s30 = scalar_lea.hbm %s1736_s2, %s1098_s21  ;;  %s1484_s8 = smov 1024  }
 0x133   : > { %s754_s7 = sshll.u32 %s741_s30, 4  ;;  %1272 = sst [smem:[#allocation11]] (%p1582_p3), %s1484_s8  ;;  %s755_s7 = int_to_ptr.hbm [resolvable:$true] %s754_s7 }
 0x134   : > { %s1485_s9 = smov 2048   ;;  %s1486_s10 = smov 16  }
 0x135   : > { %1273 = sst [smem:[#allocation11 + $0x1]] (%p1582_p3), %s1485_s9  ;;  %s1487_s16 = smov 64  }
 0x136   : > { %1274 = sst [smem:[#allocation11 + $0x2]] (%p1582_p3), %s1486_s10  ;;  %s1488_s11 = smov 4  }
 0x137   : > { %1275 = sst [smem:[#allocation11 + $0x3]] (%p1582_p3), %s1487_s16  ;;  %s1489_s20 = smov [#allocation10]  }
 0x138   : > { %1276 = sst [smem:[#allocation11 + $0x4]] (%p1582_p3), %s1487_s16  ;;  %s1490_s25 = smov 0  }
 0x139   : > { %1277 = sst [smem:[#allocation11 + $0x5]] (%p1582_p3), %s1488_s11  ;;  %s781_s24 = scalar_lea.hbm %s1737_s3, %s1098_s21 }
 0x13a   : > { %1278 = dma.general (%p1582_p3), %s753_s22, 2048, %s755_s7, %s725_s28, %s1489_s20, [#allocation11], %s1490_s25, 0  }
 0x13b   : > { %s782_s29 = sshll.u32 %s1656_s27, 4  ;;  %s784_s30 = sshll.u32 %s781_s24, 4  ;;  %s783_s29 = int_to_ptr.vmem [resolvable:$true] %s782_s29  ;;  %s785_s30 = int_to_ptr.hbm [resolvable:$true] %s784_s30 }
 0x13c   : > { %s1419_s8 = sshra.s32 %s785_s30, 4  ;;  %s1425_s28 = scalar_lea.hbm %s1737_s3, 128  ;;  %s1420_s8 = int_to_ptr.hbm [resolvable:$true] %s1419_s8 }
 0x13d   : > { %s1421_s9 = scalar_lea.hbm %s1420_s8, 64  ;;  %p1426_p11 = scmp.lt.s32.totalorder %s1420_s8, %s1737_s3 }
 0x13e   : > { %p1422_p1 = scmp.ne.s32.totalorder %s1420_s8, %s1421_s9  ;;  %p1427_p9 = scmp.lt.s32.totalorder %s1425_s28, %s1421_s9 }
 0x140   : > { %p1423_p4 = pnand %p1422_p1, %p1582_p3  ;;  %p1428_p2 = por %p1427_p9, %p1426_p11 }
 0x142   : > { %p1424_p8 = pneg %p1423_p4 }
 0x144   : > { %p1429_p10 = pnand %p1428_p2, %p1424_p8 }
 0x146   : > { %1432 = shalt.err (!%p1429_p10)
}
 0x147   : > { %s1491_s27 = smov 64   ;;  %s1492_s21 = smov 4  }
 0x148   : > { %1279 = dma.vmem_to_hbm [thread:$0]  (%p1582_p3), %s783_s29, 1024, %s785_s30, %s730_s17, %s1491_s27, %s1491_s27, %s1492_s21  }
 0x149 PF: > { %s799_s11 = sand.u32 1, %s1467_s12   ;;  %p1743_p12 = scmp.ge.s32.totalorder %s1479_s15, 2 }
 0x14a   : > { %s800_s20 = scalar_lea.sflag [#allocation4], %s799_s11 }
 0x14b   : > { %p1291_p13 = pnand %p1743_p12, %p1548_p6 }
 0x14d   : > { %p1292_p0 = pneg %p1291_p13 }
 0x14f   : > { %1458 = dma.done.wait (%p1292_p0), %s800_s20, 2048  }
 0x150   : > { %1460 = vsyncadd (%p1292_p0), %s800_s20, 4294965248  ;;  %s810_s25 = scalar_lea.sflag [#allocation9], %s799_s11 }
 0x151   : > { %1462 = dma.done.wait (%p1292_p0), %s810_s25, 1024  }
 0x152   : > { %1464 = vsyncadd (%p1292_p0), %s810_s25, 4294966272  ;;  %p21_p3 = scmp.ge.s32.totalorder %s1566_s26, 4   ;;  %s1744_s12 = smov %s1471_s13 }
 0x153   : > { %s1745_s13 = smov %s1475_s14  ;;  %s1746_s14 = smov %s1578_s4 }
 0x154   : > { %s1747_s15 = smov %s1566_s26  ;;  %23 = sbr.rel (!%p21_p3) target bundleno = 8 (0x8), region = 102 }
 0x159   :  { %816 = vsyncpa [#allocation3], 1 }
 0x15a   :  { %818 = vsyncpa [#allocation3 + $0x1], 1 }
 0x15b   :  { %819 = vsyncpa [#allocation6], 1 }
 0x15c   :  { %820 = vsyncpa [#allocation4], 1 }
 0x15d   :  { %822 = vsyncpa [#allocation4 + $0x1], 1 }
 0x15e   :  { %823 = vsyncpa [#allocation9], 1 }
 0x15f   :  { %825 = vsyncpa [#allocation9 + $0x1], 1 }

</bundles_post_ra>
